<compile_context>
chip_gen: v5e
topology: v5e:2x2
jax: 0.10.0
libtpu: 0.0.40
codegen_flags: <defaults>
</compile_context>

<pallas_src>
import functools

import jax
import jax.numpy as jnp
from jax import lax
from jax.experimental import pallas as pl
from jax.experimental.pallas import tpu as pltpu


def _round_up(n: int, m: int) -> int:
    return ((n + m - 1) // m) * m


def _vmem_capacity_bytes() -> int:
    """Per-core VMEM capacity; conservative (v7x-sized) fallback."""
    try:
        info = pltpu.get_tpu_info()
        cap = getattr(info, "vmem_capacity_bytes", None)
        if cap:
            return int(cap)
    except Exception:
        pass
    return 64 << 20


def _choose_tile_t(T: int, dim: int, num_experts: int) -> int:
    """Token-tile size: as large as the x double-buffer budget allows."""
    vmem_cap = _vmem_capacity_bytes()
    # Double-buffered bf16 x stream: 2 * tile_t * dim * 2 bytes <= ~VMEM/4.
    by_vmem = (vmem_cap // 4) // (4 * dim)
    # Keep the f32 scores/probs/iota working set (~3 * E * tile_t * 4 B) modest
    # so large-E softmax/top-k doesn't spill past the vreg file.
    by_vpu = (512 * 1024) // max(1, 3 * 4 * num_experts)
    tile = min(2048, max(128, by_vmem), max(128, by_vpu))
    if T < 128:
        return T                                   # single full-array block
    tile = max(128, (tile // 128) * 128)
    tile = min(tile, (T // 128) * 128)             # never exceed the array
    if T >= 256:
        # At least 2 token tiles so both TensorCores (v7x megacore) get work.
        tile = min(tile, _round_up(-(-T // 2), 128))
    return max(128, tile)


def _moe_gating_kernel(x_ref, w_ref, vals_ref, idx_ref, *, k: int):
    # x_ref: [TILE_T, D] bf16 (tokens on sublanes, features on lanes)
    # w_ref: [E, D]      bf16 (resident across the grid)
    x = x_ref[...]
    w = w_ref[...]

    # scores[e, t] = sum_d w[e, d] * x[t, d]  ==  w @ x.T   (trans_b form).
    # bf16 operands straight into the MXU, f32 accumulation; result is
    # [E, TILE_T]: experts on sublanes, tokens on lanes.
    scores = lax.dot_general(
        w, x,
        dimension_numbers=(((1,), (1,)), ((), ())),
        preferred_element_type=jnp.float32,
    )

    e_dim, tile_t = scores.shape

    # Softmax over experts (sublane axis 0); EUP approx reciprocal for denom.
    m = jnp.max(scores, axis=0, keepdims=True)                  # [1, TILE_T]
    e = jnp.exp(scores - m)                                     # [E, TILE_T]
    denom = jnp.sum(e, axis=0, keepdims=True)                   # [1, TILE_T]
    probs = e * pl.reciprocal(denom, approx=True)               # [E, TILE_T]

    # Iterative top-k over the expert (sublane) axis; k is small and unrolled.
    # Each round stores its row directly (no list + concatenate) to keep the
    # live-vreg count flat and avoid extra store-slot pressure.
    row_ids = lax.broadcasted_iota(jnp.int32, (e_dim, tile_t), 0)
    remaining = probs
    for j in range(k):
        mx = jnp.max(remaining, axis=0, keepdims=True)          # [1, TILE_T]
        # lowest expert index among ties (matches jax.lax.top_k / torch CPU)
        sel = jnp.min(jnp.where(remaining == mx, row_ids, e_dim),
                      axis=0, keepdims=True)                    # [1, TILE_T]
        vals_ref[pl.ds(j, 1), :] = mx.astype(vals_ref.dtype)
        idx_ref[pl.ds(j, 1), :] = sel.astype(idx_ref.dtype)
        if j + 1 < k:
            # probs >= 0 so -1.0 is a safe "already taken" sentinel.
            remaining = jnp.where(row_ids == sel, -1.0, remaining)


def moe_feedforward_gating(x, w_gate, num_activated_experts):
    """x: [..., dim] bf16; w_gate: [num_experts, dim] bf16 (nn.Linear.weight).

    Returns (topk_values [..., k] bf16, topk_indices [..., k] int32),
    matching torch.topk(F.softmax(x @ w_gate.T, -1), k, dim=-1).
    """
    orig_shape = x.shape
    dim = orig_shape[-1]
    x2 = x.reshape(-1, dim)
    T = x2.shape[0]
    E, dim_w = w_gate.shape
    assert dim_w == dim
    k = int(num_activated_experts)
    assert 1 <= k <= E, "num_activated_experts must be in [1, num_experts]"

    tile_t = _choose_tile_t(T, dim, E)
    grid = (pl.cdiv(T, tile_t),)

    itemsize = jnp.dtype(x2.dtype).itemsize
    # x double-buffer + resident gate weight (counted twice for safety) +
    # double-buffered (bf16 + i32) outputs, plus headroom for compiler scratch.
    needed = (2 * tile_t * dim * itemsize
              + 2 * E * dim * itemsize
              + 2 * k * tile_t * (2 + 4))
    vmem_cap = _vmem_capacity_bytes()
    vmem_limit = min(vmem_cap * 3 // 4, max(needed + (8 << 20), 32 << 20))

    cost = pl.CostEstimate(
        flops=2 * T * E * dim,
        transcendentals=T * E,
        bytes_accessed=T * dim * itemsize + E * dim * itemsize + k * T * (2 + 4),
    )

    vals_kT, idx_kT = pl.pallas_call(
        functools.partial(_moe_gating_kernel, k=k),
        out_shape=(
            jax.ShapeDtypeStruct((k, T), jnp.bfloat16),
            jax.ShapeDtypeStruct((k, T), jnp.int32),
        ),
        grid=grid,
        in_specs=[
            pl.BlockSpec((tile_t, dim), lambda i: (i, 0)),   # tokens streamed
            pl.BlockSpec((E, dim), lambda i: (0, 0)),        # gate weight resident
        ],
        out_specs=(
            pl.BlockSpec((k, tile_t), lambda i: (0, i)),     # lane-dense stores
            pl.BlockSpec((k, tile_t), lambda i: (0, i)),
        ),
        compiler_params=pltpu.CompilerParams(
            # Token tiles are independent -> shard across TCs on multi-core chips.
            dimension_semantics=("parallel",),
            vmem_limit_bytes=int(vmem_limit),
        ),
        cost_estimate=cost,
    )(x2, w_gate)

    # [k, T] -> [T, k] -> [..., k]  (cheap layout plumbing in XLA; any ragged
    # tail-tile garbage columns lie beyond T and are sliced off here).
    out_shape = orig_shape[:-1] + (k,)
    vals = vals_kT.T[:T].reshape(out_shape)
    idx = idx_kT.T[:T].reshape(out_shape)
    return vals, idx


if __name__ == "__main__":
    # Small shapes consistent with the module: dim=32, 8 experts, top-2.
    B, S, DIM = 2, 8, 32
    NUM_EXPERTS = 8
    NUM_ACTIVATED = 2

    key = jax.random.PRNGKey(0)
    kx, kw = jax.random.split(key)
    x = jax.random.normal(kx, (B, S, DIM), dtype=jnp.float32).astype(jnp.bfloat16)
    # deterministic "nn.Linear(dim, num_experts, bias=False)" weight: [E, dim]
    w_gate = (jax.random.normal(kw, (NUM_EXPERTS, DIM), dtype=jnp.float32)
              * (1.0 / jnp.sqrt(DIM))).astype(jnp.bfloat16)

    vals, idx = moe_feedforward_gating(x, w_gate, NUM_ACTIVATED)
    jax.block_until_ready((vals, idx))

    # Reference check in plain JAX.
    scores_ref = jnp.dot(x.astype(jnp.float32), w_gate.astype(jnp.float32).T)
    probs_ref = jax.nn.softmax(scores_ref, axis=-1)
    vals_ref, idx_ref = jax.lax.top_k(probs_ref, NUM_ACTIVATED)

    assert vals.shape == (B, S, NUM_ACTIVATED) and idx.shape == (B, S, NUM_ACTIVATED)
    assert vals.dtype == jnp.bfloat16 and idx.dtype == jnp.int32
    assert jnp.all(idx == idx_ref.astype(jnp.int32))
    assert jnp.allclose(vals.astype(jnp.float32), vals_ref, atol=2e-2, rtol=2e-2)

    print("KERNEL_OK")
</pallas_src>

<mosaic_0001>
module attributes {stable_mosaic.version = 11 : i64} {
  func.func @_moe_gating_kernel(%arg0: i32, %arg1: memref<16x32xbf16, #tpu.memory_space<vmem>>, %arg2: memref<8x32xbf16, #tpu.memory_space<vmem>>, %arg3: memref<2x16xbf16, #tpu.memory_space<vmem>>, %arg4: memref<2x16xi32, #tpu.memory_space<vmem>>) attributes {dimension_semantics = [#tpu.dimension_semantics<parallel>], iteration_bounds = array<i64: 1>, scalar_prefetch = 0 : i64, scratch_operands = 0 : i64, tpu.core_type = #tpu.core_type<tc>, window_params = [{transform_indices = @transform_0, window_bounds = array<i64: 16, 32>}, {pipeline_mode = #tpu.pipeline_mode<synchronous>, transform_indices = @transform_1, window_bounds = array<i64: 8, 32>}, {transform_indices = @transform_2, window_bounds = array<i64: 2, 16>}, {transform_indices = @transform_3, window_bounds = array<i64: 2, 16>}]} {
    %c0 = arith.constant 0 : index
    %c0_0 = arith.constant 0 : index
    %0 = vector.load %arg1[%c0, %c0_0] : memref<16x32xbf16, #tpu.memory_space<vmem>>, vector<16x32xbf16>
    %c0_1 = arith.constant 0 : index
    %c0_2 = arith.constant 0 : index
    %1 = vector.load %arg2[%c0_1, %c0_2] : memref<8x32xbf16, #tpu.memory_space<vmem>>, vector<8x32xbf16>
    %cst = arith.constant dense<0.000000e+00> : vector<8x16xf32>
    %2 = tpu.matmul %1, %0, %cst {dimension_numbers = #tpu.dot_dimension_numbers<[1], [1], [0], [0], [0, 0, 1, 0], [], []>} : vector<8x32xbf16>, vector<16x32xbf16>, vector<8x16xf32> -> vector<8x16xf32>
    %cst_3 = arith.constant dense<0xFF800000> : vector<16xf32>
    %3 = vector.multi_reduction <maximumf>, %2, %cst_3 [0] : vector<8x16xf32> to vector<16xf32>
    %4 = vector.shape_cast %3 : vector<16xf32> to vector<1x16xf32>
    %5 = vector.broadcast %4 : vector<1x16xf32> to vector<8x16xf32>
    %6 = arith.subf %2, %5 : vector<8x16xf32>
    %7 = math.exp %6 : vector<8x16xf32>
    %cst_4 = arith.constant dense<0.000000e+00> : vector<16xf32>
    %8 = vector.multi_reduction <add>, %7, %cst_4 [0] : vector<8x16xf32> to vector<16xf32>
    %9 = vector.shape_cast %8 : vector<16xf32> to vector<1x16xf32>
    %10 = tpu.reciprocal %9 {approx = true} : vector<1x16xf32> -> vector<1x16xf32>
    %11 = vector.broadcast %10 : vector<1x16xf32> to vector<8x16xf32>
    %12 = arith.mulf %7, %11 : vector<8x16xf32>
    %13 = tpu.iota {dimensions = array<i32: 0>} : vector<8x16xi32>
    %cst_5 = arith.constant dense<0xFF800000> : vector<16xf32>
    %14 = vector.multi_reduction <maximumf>, %12, %cst_5 [0] : vector<8x16xf32> to vector<16xf32>
    %15 = vector.shape_cast %14 : vector<16xf32> to vector<1x16xf32>
    %16 = vector.broadcast %15 : vector<1x16xf32> to vector<8x16xf32>
    %17 = arith.cmpf oeq, %12, %16 : vector<8x16xf32>
    %c8_i32 = arith.constant 8 : i32
    %18 = vector.broadcast %c8_i32 : i32 to vector<8x16xi32>
    %19 = arith.select %17, %13, %18 : vector<8x16xi1>, vector<8x16xi32>
    %cst_6 = arith.constant dense<2147483647> : vector<16xi32>
    %20 = vector.multi_reduction <minsi>, %19, %cst_6 [0] : vector<8x16xi32> to vector<16xi32>
    %21 = vector.shape_cast %20 : vector<16xi32> to vector<1x16xi32>
    %22 = arith.truncf %15 : vector<1x16xf32> to vector<1x16xbf16>
    %c0_7 = arith.constant 0 : index
    %c0_8 = arith.constant 0 : index
    %23 = vector.load %arg3[%c0_7, %c0_8] : memref<2x16xbf16, #tpu.memory_space<vmem>>, vector<1x16xbf16>
    tpu.vector_store %arg3[%c0_7, %c0_8], %22 {strides = array<i32>} : memref<2x16xbf16, #tpu.memory_space<vmem>>, vector<1x16xbf16>,
    %c0_9 = arith.constant 0 : index
    %c0_10 = arith.constant 0 : index
    %24 = vector.load %arg4[%c0_9, %c0_10] : memref<2x16xi32, #tpu.memory_space<vmem>>, vector<1x16xi32>
    tpu.vector_store %arg4[%c0_9, %c0_10], %21 {strides = array<i32>} : memref<2x16xi32, #tpu.memory_space<vmem>>, vector<1x16xi32>,
    %25 = vector.broadcast %21 : vector<1x16xi32> to vector<8x16xi32>
    %26 = arith.cmpi eq, %13, %25 : vector<8x16xi32>
    %cst_11 = arith.constant -1.000000e+00 : f32
    %27 = vector.broadcast %cst_11 : f32 to vector<8x16xf32>
    %28 = arith.select %26, %27, %12 : vector<8x16xi1>, vector<8x16xf32>
    %cst_12 = arith.constant dense<0xFF800000> : vector<16xf32>
    %29 = vector.multi_reduction <maximumf>, %28, %cst_12 [0] : vector<8x16xf32> to vector<16xf32>
    %30 = vector.shape_cast %29 : vector<16xf32> to vector<1x16xf32>
    %31 = vector.broadcast %30 : vector<1x16xf32> to vector<8x16xf32>
    %32 = arith.cmpf oeq, %28, %31 : vector<8x16xf32>
    %c8_i32_13 = arith.constant 8 : i32
    %33 = vector.broadcast %c8_i32_13 : i32 to vector<8x16xi32>
    %34 = arith.select %32, %13, %33 : vector<8x16xi1>, vector<8x16xi32>
    %cst_14 = arith.constant dense<2147483647> : vector<16xi32>
    %35 = vector.multi_reduction <minsi>, %34, %cst_14 [0] : vector<8x16xi32> to vector<16xi32>
    %36 = vector.shape_cast %35 : vector<16xi32> to vector<1x16xi32>
    %37 = arith.truncf %30 : vector<1x16xf32> to vector<1x16xbf16>
    %c1 = arith.constant 1 : index
    %c0_15 = arith.constant 0 : index
    %38 = vector.load %arg3[%c1, %c0_15] : memref<2x16xbf16, #tpu.memory_space<vmem>>, vector<1x16xbf16>
    tpu.vector_store %arg3[%c1, %c0_15], %37 {strides = array<i32>} : memref<2x16xbf16, #tpu.memory_space<vmem>>, vector<1x16xbf16>,
    %c1_16 = arith.constant 1 : index
    %c0_17 = arith.constant 0 : index
    %39 = vector.load %arg4[%c1_16, %c0_17] : memref<2x16xi32, #tpu.memory_space<vmem>>, vector<1x16xi32>
    tpu.vector_store %arg4[%c1_16, %c0_17], %36 {strides = array<i32>} : memref<2x16xi32, #tpu.memory_space<vmem>>, vector<1x16xi32>,
    return
  }
  func.func @transform_0(%arg0: i32) -> (i32, i32) {
    %c0_i32 = arith.constant 0 : i32
    %c0_i32_0 = arith.constant 0 : i32
    return %arg0, %c0_i32 : i32, i32
  }
  func.func @transform_1(%arg0: i32) -> (i32, i32) {
    %c0_i32 = arith.constant 0 : i32
    %c0_i32_0 = arith.constant 0 : i32
    %c0_i32_1 = arith.constant 0 : i32
    return %c0_i32, %c0_i32_0 : i32, i32
  }
  func.func @transform_2(%arg0: i32) -> (i32, i32) {
    %c0_i32 = arith.constant 0 : i32
    %c0_i32_0 = arith.constant 0 : i32
    return %c0_i32, %arg0 : i32, i32
  }
  func.func @transform_3(%arg0: i32) -> (i32, i32) {
    %c0_i32 = arith.constant 0 : i32
    %c0_i32_0 = arith.constant 0 : i32
    return %c0_i32, %arg0 : i32, i32
  }
}

</mosaic_0001>

<bundles_post_ra>
// kernel: tpu_custom_call.1
= control target key start
LH: loop header
LB: loop body
LE: loop exit
PB: predicated region body
PF: predicated region fallthrough
CT: control target
= control target key end

     0   :  { %9 = vsyncpa [#allocation3], 0  ;;  %s354_s0 = inlined_call_operand.hbm [shape: bf16[16,32], index: 0, kind: input, shape index: {}]   ;;  %s355_s1 = inlined_call_operand.hbm [shape: bf16[8,32], index: 1, kind: input, shape index: {}]   ;;  %s356_s2 = inlined_call_operand.hbm [shape: bf16[2,16], index: 2, kind: output, shape index: {0}]   ;;  %s357_s3 = inlined_call_operand.hbm [shape: s32[2,16], index: 3, kind: output, shape index: {1}]  }
   0x1   :  { %10 = vsyncpa [#allocation6], 0 }
   0x2   :  { %11 = vsyncpa [#allocation4], 0 }
   0x3   :  { %12 = vsyncpa [#allocation9], 0  ;;  %s17_s14 = sshll.u32 %s354_s0, 4  ;;  %s306_s15 = smov [#allocation2]   ;;  %s18_s14 = int_to_ptr.hbm [resolvable:$true] %s17_s14 }
   0x4   :  { %s19_s16 = sshll.u32 %s306_s15, 4  ;;  %s31_s19 = sshll.u32 %s355_s1, 4  ;;  %s20_s16 = int_to_ptr.vmem [resolvable:$true] %s19_s16  ;;  %s32_s19 = int_to_ptr.hbm [resolvable:$true] %s31_s19 }
   0x5   :  { %s307_s20 = smov 64   ;;  %s308_s21 = smov 4  }
   0x6   :  { %25 = dma.hbm_to_vmem [thread:$0]  %s18_s14, 128, %s20_s16, [#allocation3], %s307_s20, %s307_s20, %s308_s21  }
   0x7   :  { %s309_s22 = smov [#allocation5]  }
   0x8   :  { %s33_s23 = sshll.u32 %s309_s22, 4  ;;  %s34_s23 = int_to_ptr.vmem [resolvable:$true] %s33_s23 }
   0x9   :  { %36 = dma.hbm_to_vmem [thread:$0]  %s32_s19, 64, %s34_s23, [#allocation6]  }
   0xa   :  { %298 = dma.done.wait [#allocation3], 128  }
   0xb   :  { %299 = vsyncadd [#allocation3], 4294967168 }
   0xc   :  { %300 = dma.done.wait [#allocation6], 64  }
   0xd   :  { %301 = vsyncadd [#allocation6], 4294967232  ;;  %vm54_vm0 = vcmask 261120   ;;  %v191_v0 = vld [vmem:[#allocation2] sm:$0xff]  ;;  %v48_v2 = vld [vmem:[#allocation5] sm:$0xf]  ;;  %v94_v28 = vlaneseq }
   0xe   :  { %v59_v1 = vsel %vm54_vm0, %v191_v0, 0  ;;  %vm74_vm1 = vcmask 130048   ;;  %vm116_vm2 = vcmask 122880   ;;  %vm117_vm3 = vsmask.f32 256  ;;  %s310_s0 = smov [#allocation7]  }
   0xf   :  { %68 = vmatpush.bf16.xpose.msra.mxu0 %v59_v1  ;;  %v95_v31 = vshrl.u32 %v94_v28, 7  ;;  %vm118_vm4 = vmand %vm116_vm2, %vm117_vm3  ;;  %v119_v33 = vld [vmem:[#allocation7] sm:$0x1]  ;;  %vm146_vm10 = vsmask.f32 7938  ;;  %s157_s1 = sshll.u32 %s310_s0, 4  ;;  %s158_s1 = int_to_ptr.vmem [resolvable:$true] %s157_s1 }
  0x10   :  { %s159_s26 = sshll.u32 %s356_s2, 4  ;;  %vm147_vm11 = vmand %vm116_vm2, %vm146_vm10  ;;  %s311_s2 = smov [#allocation8]   ;;  %s160_s26 = int_to_ptr.hbm [resolvable:$true] %s159_s26 }
  0x11   :  { %s168_s27 = sshll.u32 %s311_s2, 4  ;;  %s170_s30 = sshll.u32 %s357_s3, 4  ;;  %s169_s27 = int_to_ptr.vmem [resolvable:$true] %s168_s27  ;;  %s171_s30 = int_to_ptr.hbm [resolvable:$true] %s170_s30 }
  0x16   :  { %190 = vmatmul.msk.bf16.vlgmr.msra.gmra.mxu0 %vm54_vm0, %v48_v2 }
  0x93   :  { %v70_v3 = vpop.f32.mrf.mxu0 }
  0x94   :  { %v75_v4 = vsel %vm74_vm1, %v70_v3, -inf }
  0x95   :  { %v76_v5 = vrot.slane %v75_v4, 4 }
  0x97   :  { %v77_v6 = vmax.f32 %v75_v4, %v76_v5 }
  0x99   :  { %v78_v7 = vrot.slane %v77_v6, 2 }
  0x9b   :  { %v79_v8 = vmax.f32 %v77_v6, %v78_v7  ;;  %v72_v9 = vpop.f32.mrf.mxu0 }
  0x9d   :  { %v80_v10 = vrot.slane %v79_v8, 1 }
  0x9f   :  { %v81_v11 = vmax.f32 %v79_v8, %v80_v10 }
  0xa1   :  { %v82_v12 = vsub.f32 %v70_v3, %v81_v11 }
  0xa3   :  { %v83_v13 = vmul.f32 1.442695, %v82_v12 }
  0xa5   :  { %198 = vpow2.f32 %v83_v13 }
  0xab   :  { %v199_v14 = vpop.eup %198 }
  0xac   :  { %v85_v15 = vsel %vm74_vm1, %v199_v14, 0.0 }
  0xad   :  { %v86_v16 = vrot.slane %v85_v15, 4 }
  0xaf   :  { %v87_v17 = vadd.f32 %v86_v16, %v85_v15 }
  0xb1   :  { %v88_v18 = vrot.slane %v87_v17, 2 }
  0xb3   :  { %v89_v19 = vadd.f32 %v88_v18, %v87_v17 }
  0xb5   :  { %v90_v20 = vrot.slane %v89_v19, 1 }
  0xb7   :  { %v91_v21 = vadd.f32 %v90_v20, %v89_v19 }
  0xb9   :  { %200 = vrcp.f32 %v91_v21 }
  0xbf   :  { %v201_v22 = vpop.eup %200 }
  0xc0   :  { %v93_v23 = vmul.f32 %v201_v22, %v199_v14 }
  0xc2   :  { %v96_v24 = vsel %vm74_vm1, %v93_v23, -inf }
  0xc3   :  { %v97_v25 = vrot.slane %v96_v24, 4 }
  0xc5   :  { %v98_v26 = vmax.f32 %v96_v24, %v97_v25 }
  0xc7   :  { %v99_v27 = vrot.slane %v98_v26, 2 }
  0xc9   :  { %v100_v29 = vmax.f32 %v98_v26, %v99_v27 }
  0xcb   :  { %v101_v30 = vrot.slane %v100_v29, 1 }
  0xcd   :  { %v102_v32 = vmax.f32 %v100_v29, %v101_v30 }
  0xcf   :  { %vm103_vm5 = vcmp.eq.f32.partialorder %v93_v23, %v102_v32  ;;  %v115_v34 = vpack.c.bf16 %v102_v32, %v102_v32 }
  0xd0   :  { %v104_v35 = vsel %vm103_vm5, %v95_v31, 8 }
  0xd1   :  { %v105_v36 = vsel %vm74_vm1, %v104_v35, 2147483647  ;;  %v120_v37 = vsel %vm118_vm4, %v115_v34, %v119_v33 }
  0xd2   :  { %v106_v38 = vrot.slane %v105_v36, 4  ;;  %121 = vst [vmem:[#allocation7] sm:$0x1] %v120_v37 }
  0xd4   :  { %vm107_vm6 = vcmp.lt.s32.totalorder %v105_v36, %v106_v38 }
  0xd5   :  { %v108_v39 = vsel %vm107_vm6, %v105_v36, %v106_v38 }
  0xd6   :  { %v109_v40 = vrot.slane %v108_v39, 2 }
  0xd8   :  { %vm110_vm7 = vcmp.lt.s32.totalorder %v108_v39, %v109_v40 }
  0xd9   :  { %v111_v41 = vsel %vm110_vm7, %v108_v39, %v109_v40  ;;  %v148_v53 = vld [vmem:[#allocation7] sm:$0x1] }
  0xda   :  { %v112_v42 = vrot.slane %v111_v41, 1 }
  0xdc   :  { %vm113_vm8 = vcmp.lt.s32.totalorder %v111_v41, %v112_v42 }
  0xdd   :  { %v114_v43 = vsel %vm113_vm8, %v111_v41, %v112_v42 }
  0xde   :  { %vm124_vm9 = vcmp.eq.s32.totalorder %v95_v31, %v114_v43  ;;  %123 = vst.msk [vmem:[#allocation8] sm:$0x1] %vm116_vm2, %v114_v43 }
  0xdf   :  { %v125_v44 = vsel %vm124_vm9, -1.0, %v93_v23 }
  0xe0   :  { %v126_v45 = vsel %vm74_vm1, %v125_v44, -inf }
  0xe1   :  { %v127_v46 = vrot.slane %v126_v45, 4 }
  0xe3   :  { %v128_v47 = vmax.f32 %v126_v45, %v127_v46 }
  0xe5   :  { %v129_v48 = vrot.slane %v128_v47, 2 }
  0xe7   :  { %v130_v49 = vmax.f32 %v128_v47, %v129_v48 }
  0xe9   :  { %v131_v50 = vrot.slane %v130_v49, 1 }
  0xeb   :  { %v132_v51 = vmax.f32 %v130_v49, %v131_v50 }
  0xed   :  { %vm133_vm12 = vcmp.eq.f32.partialorder %v125_v44, %v132_v51  ;;  %v145_v52 = vpack.c.bf16 %v132_v51, %v132_v51 }
  0xee   :  { %v134_v54 = vsel %vm133_vm12, %v95_v31, 8 }
  0xef   :  { %v149_v55 = vsel %vm147_vm11, %v145_v52, %v148_v53  ;;  %v135_v56 = vsel %vm74_vm1, %v134_v54, 2147483647 }
  0xf0   :  { %150 = vst [vmem:[#allocation7] sm:$0x1] %v149_v55  ;;  %v136_v57 = vrot.slane %v135_v56, 4 }
  0xf1   :  { %162 = dma.vmem_to_hbm [thread:$0]  %s158_s1, 16, %s160_s26, [#allocation4]  }
  0xf2   :  { %vm137_vm13 = vcmp.lt.s32.totalorder %v135_v56, %v136_v57 }
  0xf3   :  { %v138_v58 = vsel %vm137_vm13, %v135_v56, %v136_v57 }
  0xf4   :  { %v139_v59 = vrot.slane %v138_v58, 2 }
  0xf6   :  { %vm140_vm14 = vcmp.lt.s32.totalorder %v138_v58, %v139_v59 }
  0xf7   :  { %v141_v60 = vsel %vm140_vm14, %v138_v58, %v139_v59 }
  0xf8   :  { %v142_v61 = vrot.slane %v141_v60, 1 }
  0xfa   :  { %vm143_vm15 = vcmp.lt.s32.totalorder %v141_v60, %v142_v61 }
  0xfb   :  { %v144_v62 = vsel %vm143_vm15, %v141_v60, %v142_v61 }
  0xfc   :  { %151 = vst.msk [vmem:[#allocation8 + $0x1] sm:$0x1] %vm116_vm2, %v144_v62 }
  0xfd   :  { %173 = dma.vmem_to_hbm [thread:$0]  %s169_s27, 32, %s171_s30, [#allocation9]  }
  0xfe   :  { %302 = dma.done.wait [#allocation4], 16  }
  0xff   :  { %303 = vsyncadd [#allocation4], 4294967280 }
 0x100   :  { %304 = dma.done.wait [#allocation9], 32  }
 0x101   :  { %305 = vsyncadd [#allocation9], 4294967264 }
 0x102   :  { %182 = vsyncpa [#allocation3], 1 }
 0x103   :  { %183 = vsyncpa [#allocation6], 1 }
 0x104   :  { %184 = vsyncpa [#allocation4], 1 }
 0x105   :  { %185 = vsyncpa [#allocation9], 1 }

</bundles_post_ra>
